<compile_context>
chip_gen: v7x
topology: tpu7x:2x2x1
jax: 0.10.0
libtpu: 0.0.40
codegen_flags: <defaults>
</compile_context>

<pallas_src>
import jax
import jax.numpy as jnp
from jax.experimental import pallas as pl
from jax.experimental.pallas import tpu as pltpu


def _round_up(x, m):
    return ((x + m - 1) // m) * m


def _pick_tk(d128, tk_max):
    """Largest multiple of 128 <= tk_max that divides d128 (d128 % 128 == 0)."""
    tk = max(128, min((tk_max // 128) * 128, d128))
    while tk > 128 and d128 % tk != 0:
        tk -= 128
    return tk


def _maybe_buffered_spec(shape, index_map, nbuf):
    """BlockSpec with N-deep pipelining when the installed API supports it."""
    try:
        return pl.BlockSpec(shape, index_map, pipeline_mode=pl.Buffered(nbuf))
    except Exception:
        return pl.BlockSpec(shape, index_map)


def _make_kernel(*, resident, combined, R_pad, N_pad, TB, chunk):
    """Build the fused kernel body (all geometry is closed over statically)."""
    offs = [(o, min(chunk, TB - o)) for o in range(0, TB, chunk)]

    def compute_chunk(z_pre, bb, whead, bhead):
        # Backbone bias + ReLU, then both heads off one fused RHS [wi | wc].
        z = jnp.maximum(z_pre + bb, 0.0)
        h = jnp.dot(z, whead, preferred_element_type=jnp.float32) + bhead
        interv = h[:, :R_pad]
        y = h[:, R_pad:]
        int_z = z + interv
        # classifier(int_z) = classifier(z) + interv @ wc  (bc added once in y)
        int_y = y + jnp.dot(interv, whead[:, R_pad:],
                            preferred_element_type=jnp.float32)
        return z, int_z, interv, y, int_y

    if combined:
        def store_chunk(extra_refs, out_refs, off, sz, vals):
            # Pack the five narrow results into one lane-dense 128-wide slab
            # using exact 0/1 selection matmuls (no lane-shuffle relayouts).
            (pack_ref,) = extra_refs
            (out_ref,) = out_refs
            pk = pack_ref[...]
            packed = None
            for idx, v in enumerate(vals):
                d = jnp.dot(v, pk[idx * 128:(idx + 1) * 128, :],
                            preferred_element_type=jnp.float32)
                packed = d if packed is None else packed + d
            out_ref[pl.ds(off, sz), :] = packed
    else:
        def store_chunk(extra_refs, out_refs, off, sz, vals):
            rep_ref, logit_ref = out_refs
            z, int_z, interv, y, int_y = vals
            rep_ref[pl.ds(off, sz), 0:R_pad] = z
            rep_ref[pl.ds(off, sz), R_pad:2 * R_pad] = int_z
            rep_ref[pl.ds(off, sz), 2 * R_pad:3 * R_pad] = interv
            logit_ref[pl.ds(off, sz), 0:N_pad] = y
            logit_ref[pl.ds(off, sz), N_pad:2 * N_pad] = int_y

    n_extra = 1 if combined else 0
    n_out = 1 if combined else 2

    if resident:
        def kernel(x_ref, wb_ref, bb_ref, whead_ref, bhead_ref, *rest):
            extra_refs = rest[:n_extra]
            out_refs = rest[n_extra:n_extra + n_out]
            bb = bb_ref[...]
            whead = whead_ref[...]
            bhead = bhead_ref[...]
            for off, sz in offs:
                z_pre = jnp.dot(x_ref[pl.ds(off, sz), :], wb_ref[...],
                                preferred_element_type=jnp.float32)
                vals = compute_chunk(z_pre, bb, whead, bhead)
                store_chunk(extra_refs, out_refs, off, sz, vals)
        return kernel

    def kernel(x_ref, wb_ref, bb_ref, whead_ref, bhead_ref, *rest):
        extra_refs = rest[:n_extra]
        out_refs = rest[n_extra:n_extra + n_out]
        acc_ref = rest[n_extra + n_out]
        k = pl.program_id(1)

        @pl.when(k == 0)
        def _():
            acc_ref[...] = jnp.zeros_like(acc_ref)

        acc_ref[...] += jnp.dot(x_ref[...], wb_ref[...],
                                preferred_element_type=jnp.float32)

        @pl.when(k == pl.num_programs(1) - 1)
        def _():
            bb = bb_ref[...]
            whead = whead_ref[...]
            bhead = bhead_ref[...]
            for off, sz in offs:
                vals = compute_chunk(acc_ref[pl.ds(off, sz), :],
                                     bb, whead, bhead)
                store_chunk(extra_refs, out_refs, off, sz, vals)

    return kernel


def casn_forward(x_nchw, params, *, tb=256, tk=1024,
                 compute_dtype=jnp.float32, force_stream=False):
    """x_nchw: (B, C, H, W).  Returns (z, int_z, y, int_y, intervention)."""
    wb, bb, wi, bi, wc, bc = params
    B = x_nchw.shape[0]
    D_IN, R = wb.shape
    NCLS = wc.shape[1]
    f32 = jnp.float32

    R_pad = _round_up(R, 128)
    N_pad = _round_up(NCLS, 128)
    HW = R_pad + N_pad
    D_pad = _round_up(D_IN, 128)

    # ---- Batch tiling: tiny batches use one full tile; otherwise split into
    # at least two tiles (keeps both v7x TensorCores busy), capped at `tb`.
    if B <= 8:
        TB = B
    else:
        TB = min(_round_up(tb, 8), _round_up(-(-B // 2), 8))
    B_pad = _round_up(B, TB)
    n_btiles = B_pad // TB
    chunk = min(TB, 128)

    x_item = jnp.dtype(compute_dtype).itemsize

    # ---- VMEM budget (v7x: 64 MiB / TC, v5e / v6e: 128 MiB).
    try:
        vmem_cap = int(pltpu.get_tpu_info().vmem_capacity_bytes)
    except Exception:
        vmem_cap = 64 * 1024 * 1024
    vmem_limit = int(min(96 * 1024 * 1024, (vmem_cap * 3) // 4))

    combined = (3 * R + 2 * NCLS) <= 128
    out_widths = (128,) if combined else (3 * R_pad, 2 * N_pad)
    out_bytes = 2 * TB * sum(out_widths) * 4            # double-buffered outs
    head_bytes = 4 * (R_pad * HW + 2 * HW + R_pad)
    if combined:
        head_bytes += 4 * 5 * 128 * 128                  # pack matrix

    # ---- Resident-wb fast path decision.
    wb_bytes = D_pad * R_pad * x_item
    resident_cost = wb_bytes + 2 * TB * D_pad * x_item + head_bytes + out_bytes
    resident = (not force_stream) and resident_cost <= (vmem_limit * 3) // 4

    if resident:
        TK = D_pad
        grid = (n_btiles,)
        dim_sem = ("parallel",)
    else:
        TK = _pick_tk(D_pad, tk)

        def _stream_cost(tk_):
            return (3 * TB * tk_ * x_item + 3 * tk_ * R_pad * x_item
                    + TB * R_pad * 4 + head_bytes + out_bytes)

        while TK > 128 and _stream_cost(TK) > (vmem_limit * 3) // 4:
            TK = _pick_tk(D_pad, TK - 128)
        grid = (n_btiles, D_pad // TK)
        dim_sem = ("parallel", "arbitrary")

    # ---- Operand prep (pads are skipped entirely when already aligned).
    def pad2(a, rows, cols, dtype=f32):
        a = jnp.asarray(a, dtype).reshape((-1, a.shape[-1]))
        if a.shape == (rows, cols):
            return a
        return jnp.zeros((rows, cols), dtype).at[:a.shape[0], :a.shape[1]].set(a)

    x_p = pad2(x_nchw.reshape(B, -1), B_pad, D_pad, compute_dtype)
    wb_p = pad2(wb, D_pad, R_pad, compute_dtype)
    bb_p = pad2(bb, 1, R_pad)
    whead_p = jnp.concatenate(
        [pad2(wi, R_pad, R_pad), pad2(wc, R_pad, N_pad)], axis=1)   # [wi | wc]
    bhead_p = jnp.concatenate([pad2(bi, 1, R_pad), pad2(bc, 1, N_pad)], axis=1)

    inputs = [x_p, wb_p, bb_p, whead_p, bhead_p]
    if combined:
        # Exact 0/1 selection matrix: row block j (of 128) scatters result j
        # into its lane range inside the single 128-wide output slab.
        pk = jnp.zeros((5 * 128, 128), f32)
        ir = jnp.arange(R)
        ic = jnp.arange(NCLS)
        pk = pk.at[ir, ir].set(1.0)                          # z      -> [0, R)
        pk = pk.at[128 + ir, R + ir].set(1.0)                # int_z  -> [R, 2R)
        pk = pk.at[256 + ir, 2 * R + ir].set(1.0)            # interv -> [2R, 3R)
        pk = pk.at[384 + ic, 3 * R + ic].set(1.0)            # y
        pk = pk.at[512 + ic, 3 * R + NCLS + ic].set(1.0)     # int_y
        inputs.append(pk)

    # ---- Specs.
    if resident:
        in_specs = [
            pl.BlockSpec((TB, D_pad), lambda i: (i, 0)),          # x streams
            pl.BlockSpec((D_pad, R_pad), lambda i: (0, 0)),       # wb resident
            pl.BlockSpec((1, R_pad), lambda i: (0, 0)),           # bb resident
            pl.BlockSpec((R_pad, HW), lambda i: (0, 0)),          # [wi|wc]
            pl.BlockSpec((1, HW), lambda i: (0, 0)),              # [bi|bc]
        ]
        const_map = lambda i: (0, 0)
        out_map = lambda i: (i, 0)
    else:
        in_specs = [
            _maybe_buffered_spec((TB, TK), lambda i, k: (i, k), 3),    # x
            _maybe_buffered_spec((TK, R_pad), lambda i, k: (k, 0), 3),  # wb
            pl.BlockSpec((1, R_pad), lambda i, k: (0, 0)),
            pl.BlockSpec((R_pad, HW), lambda i, k: (0, 0)),
            pl.BlockSpec((1, HW), lambda i, k: (0, 0)),
        ]
        const_map = lambda i, k: (0, 0)
        out_map = lambda i, k: (i, 0)
    if combined:
        in_specs.append(pl.BlockSpec((5 * 128, 128), const_map))

    if combined:
        out_shape = jax.ShapeDtypeStruct((B_pad, 128), f32)
        out_specs = pl.BlockSpec((TB, 128), out_map)
    else:
        out_shape = (jax.ShapeDtypeStruct((B_pad, 3 * R_pad), f32),
                     jax.ShapeDtypeStruct((B_pad, 2 * N_pad), f32))
        out_specs = (pl.BlockSpec((TB, 3 * R_pad), out_map),
                     pl.BlockSpec((TB, 2 * N_pad), out_map))

    scratch = [] if resident else [pltpu.VMEM((TB, R_pad), jnp.float32)]

    # ---- Cost hint (includes wb re-reads in the streamed regime).
    flops = (2 * B_pad * D_pad * R_pad
             + 2 * B_pad * R_pad * HW
             + 2 * B_pad * R_pad * N_pad)
    if combined:
        flops += 2 * B_pad * 128 * 128 * 5
    wb_read_mult = 1 if resident else n_btiles
    bytes_accessed = int(x_p.size * x_item
                         + wb_p.size * x_item * wb_read_mult
                         + 4 * (bb_p.size + whead_p.size + bhead_p.size)
                         + 4 * B_pad * sum(out_widths))

    kernel = _make_kernel(resident=resident, combined=combined,
                          R_pad=R_pad, N_pad=N_pad, TB=TB, chunk=chunk)

    result = pl.pallas_call(
        kernel,
        out_shape=out_shape,
        grid=grid,
        in_specs=in_specs,
        out_specs=out_specs,
        scratch_shapes=scratch,
        compiler_params=pltpu.CompilerParams(
            dimension_semantics=dim_sem,
            vmem_limit_bytes=vmem_limit),
        cost_estimate=pl.CostEstimate(flops=flops, transcendentals=0,
                                      bytes_accessed=bytes_accessed),
    )(*inputs)

    if combined:
        slab = result
        z = slab[:B, 0:R]
        int_z = slab[:B, R:2 * R]
        interv = slab[:B, 2 * R:3 * R]
        y = slab[:B, 3 * R:3 * R + NCLS]
        int_y = slab[:B, 3 * R + NCLS:3 * R + 2 * NCLS]
    else:
        rep_full, logit_full = result
        z = rep_full[:B, :R]
        int_z = rep_full[:B, R_pad:R_pad + R]
        interv = rep_full[:B, 2 * R_pad:2 * R_pad + R]
        y = logit_full[:B, :NCLS]
        int_y = logit_full[:B, N_pad:N_pad + NCLS]
    return z, int_z, y, int_y, interv


def init_params(key, d_in, rep_dim, num_classes):
    """Deterministic Linear-style init (uniform +/- 1/sqrt(fan_in)), f32."""
    ks = jax.random.split(key, 6)

    def lin(kw, kb, fan_in, fan_out):
        bound = 1.0 / jnp.sqrt(jnp.float32(fan_in))
        w = jax.random.uniform(kw, (fan_in, fan_out), jnp.float32, -bound, bound)
        b = jax.random.uniform(kb, (1, fan_out), jnp.float32, -bound, bound)
        return w, b

    wb, bb = lin(ks[0], ks[1], d_in, rep_dim)          # backbone linear
    wi, bi = lin(ks[2], ks[3], rep_dim, rep_dim)       # intervener
    wc, bc = lin(ks[4], ks[5], rep_dim, num_classes)   # classifier
    return (wb, bb, wi, bi, wc, bc)


def casn_reference(x_nchw, params):
    wb, bb, wi, bi, wc, bc = params
    B = x_nchw.shape[0]
    x = x_nchw.reshape(B, -1).astype(jnp.float32)
    z = jnp.maximum(x @ wb + bb, 0.0)
    intervention = z @ wi + bi
    int_z = z + intervention
    y = z @ wc + bc
    int_y = int_z @ wc + bc
    return z, int_z, y, int_y, intervention


if __name__ == "__main__":
    key = jax.random.PRNGKey(0)
    k_x, k_p, k_x2, k_p2 = jax.random.split(key, 4)

    # --- Case 1: nominal small shapes -> resident-wb fast path + single
    #     packed 128-lane output slab.
    B, C, H, W = 2, 4, 16, 16
    REP_DIM, NUM_CLASSES = 32, 10
    D_IN = C * H * W
    x = jax.random.normal(k_x, (B, C, H, W), jnp.float32)
    params = init_params(k_p, D_IN, REP_DIM, NUM_CLASSES)

    outs = jax.block_until_ready(casn_forward(x, params))
    refs = casn_reference(x, params)
    for o, r in zip(outs, refs):
        assert o.shape == r.shape and o.dtype == r.dtype
        assert jnp.allclose(o, r, atol=1e-4, rtol=1e-4)

    # --- Case 2: exercise the streamed K-tiled path + two-slab outputs.
    B2, C2, H2, W2 = 16, 8, 16, 16
    REP2, NCLS2 = 128, 10
    D2 = C2 * H2 * W2
    x2 = jax.random.normal(k_x2, (B2, C2, H2, W2), jnp.float32)
    params2 = init_params(k_p2, D2, REP2, NCLS2)

    outs2 = jax.block_until_ready(
        casn_forward(x2, params2, tb=256, tk=1024, force_stream=True))
    refs2 = casn_reference(x2, params2)
    for o, r in zip(outs2, refs2):
        assert o.shape == r.shape and o.dtype == r.dtype
        assert jnp.allclose(o, r, atol=1e-4, rtol=1e-4)

    print("KERNEL_OK")
</pallas_src>

<mosaic_0001>
module attributes {stable_mosaic.version = 11 : i64} {
  func.func @kernel(%arg0: i32, %arg1: memref<2x1024xf32, #tpu.memory_space<vmem>>, %arg2: memref<1024x128xf32, #tpu.memory_space<vmem>>, %arg3: memref<1x128xf32, #tpu.memory_space<vmem>>, %arg4: memref<128x256xf32, #tpu.memory_space<vmem>>, %arg5: memref<1x256xf32, #tpu.memory_space<vmem>>, %arg6: memref<640x128xf32, #tpu.memory_space<vmem>>, %arg7: memref<2x128xf32, #tpu.memory_space<vmem>>) attributes {dimension_semantics = [#tpu.dimension_semantics<parallel>], iteration_bounds = array<i64: 1>, scalar_prefetch = 0 : i64, scratch_operands = 0 : i64, tpu.core_type = #tpu.core_type<tc>, window_params = [{transform_indices = @transform_0, window_bounds = array<i64: 2, 1024>}, {pipeline_mode = #tpu.pipeline_mode<synchronous>, transform_indices = @transform_1, window_bounds = array<i64: 1024, 128>}, {pipeline_mode = #tpu.pipeline_mode<synchronous>, transform_indices = @transform_2, window_bounds = array<i64: 1, 128>}, {pipeline_mode = #tpu.pipeline_mode<synchronous>, transform_indices = @transform_3, window_bounds = array<i64: 128, 256>}, {pipeline_mode = #tpu.pipeline_mode<synchronous>, transform_indices = @transform_4, window_bounds = array<i64: 1, 256>}, {pipeline_mode = #tpu.pipeline_mode<synchronous>, transform_indices = @transform_5, window_bounds = array<i64: 640, 128>}, {transform_indices = @transform_6, window_bounds = array<i64: 2, 128>}]} {
    %c0 = arith.constant 0 : index
    %c0_0 = arith.constant 0 : index
    %0 = vector.load %arg3[%c0, %c0_0] : memref<1x128xf32, #tpu.memory_space<vmem>>, vector<1x128xf32>
    %c0_1 = arith.constant 0 : index
    %c0_2 = arith.constant 0 : index
    %1 = vector.load %arg4[%c0_1, %c0_2] : memref<128x256xf32, #tpu.memory_space<vmem>>, vector<128x256xf32>
    %c0_3 = arith.constant 0 : index
    %c0_4 = arith.constant 0 : index
    %2 = vector.load %arg5[%c0_3, %c0_4] : memref<1x256xf32, #tpu.memory_space<vmem>>, vector<1x256xf32>
    %c0_5 = arith.constant 0 : index
    %c0_6 = arith.constant 0 : index
    %3 = vector.load %arg1[%c0_5, %c0_6] : memref<2x1024xf32, #tpu.memory_space<vmem>>, vector<2x1024xf32>
    %c0_7 = arith.constant 0 : index
    %c0_8 = arith.constant 0 : index
    %4 = vector.load %arg2[%c0_7, %c0_8] : memref<1024x128xf32, #tpu.memory_space<vmem>>, vector<1024x128xf32>
    %cst = arith.constant dense<0.000000e+00> : vector<2x128xf32>
    %5 = tpu.matmul %3, %4, %cst {dimension_numbers = #tpu.dot_dimension_numbers<[1], [0], [0], [1], [0, 0, 1, 1], [], []>} : vector<2x1024xf32>, vector<1024x128xf32>, vector<2x128xf32> -> vector<2x128xf32>
    %6 = vector.broadcast %0 : vector<1x128xf32> to vector<2x128xf32>
    %7 = arith.addf %5, %6 : vector<2x128xf32>
    %cst_9 = arith.constant 0.000000e+00 : f32
    %8 = vector.broadcast %cst_9 : f32 to vector<2x128xf32>
    %9 = arith.maximumf %7, %8 : vector<2x128xf32>
    %cst_10 = arith.constant dense<0.000000e+00> : vector<2x256xf32>
    %10 = tpu.matmul %9, %1, %cst_10 {dimension_numbers = #tpu.dot_dimension_numbers<[1], [0], [0], [1], [0, 0, 1, 1], [], []>} : vector<2x128xf32>, vector<128x256xf32>, vector<2x256xf32> -> vector<2x256xf32>
    %11 = vector.broadcast %2 : vector<1x256xf32> to vector<2x256xf32>
    %12 = arith.addf %10, %11 : vector<2x256xf32>
    %13 = vector.extract_strided_slice %12 {offsets = [0, 0], sizes = [2, 128], strides = [1, 1]} : vector<2x256xf32> to vector<2x128xf32>
    %14 = vector.extract_strided_slice %12 {offsets = [0, 128], sizes = [2, 128], strides = [1, 1]} : vector<2x256xf32> to vector<2x128xf32>
    %15 = arith.addf %9, %13 : vector<2x128xf32>
    %16 = vector.extract_strided_slice %1 {offsets = [0, 128], sizes = [128, 128], strides = [1, 1]} : vector<128x256xf32> to vector<128x128xf32>
    %cst_11 = arith.constant dense<0.000000e+00> : vector<2x128xf32>
    %17 = tpu.matmul %13, %16, %cst_11 {dimension_numbers = #tpu.dot_dimension_numbers<[1], [0], [0], [1], [0, 0, 1, 1], [], []>} : vector<2x128xf32>, vector<128x128xf32>, vector<2x128xf32> -> vector<2x128xf32>
    %18 = arith.addf %14, %17 : vector<2x128xf32>
    %c0_12 = arith.constant 0 : index
    %c0_13 = arith.constant 0 : index
    %19 = vector.load %arg6[%c0_12, %c0_13] : memref<640x128xf32, #tpu.memory_space<vmem>>, vector<640x128xf32>
    %20 = vector.extract_strided_slice %19 {offsets = [0, 0], sizes = [128, 128], strides = [1, 1]} : vector<640x128xf32> to vector<128x128xf32>
    %cst_14 = arith.constant dense<0.000000e+00> : vector<2x128xf32>
    %21 = tpu.matmul %9, %20, %cst_14 {dimension_numbers = #tpu.dot_dimension_numbers<[1], [0], [0], [1], [0, 0, 1, 1], [], []>} : vector<2x128xf32>, vector<128x128xf32>, vector<2x128xf32> -> vector<2x128xf32>
    %22 = vector.extract_strided_slice %19 {offsets = [128, 0], sizes = [128, 128], strides = [1, 1]} : vector<640x128xf32> to vector<128x128xf32>
    %cst_15 = arith.constant dense<0.000000e+00> : vector<2x128xf32>
    %23 = tpu.matmul %15, %22, %cst_15 {dimension_numbers = #tpu.dot_dimension_numbers<[1], [0], [0], [1], [0, 0, 1, 1], [], []>} : vector<2x128xf32>, vector<128x128xf32>, vector<2x128xf32> -> vector<2x128xf32>
    %24 = arith.addf %21, %23 : vector<2x128xf32>
    %25 = vector.extract_strided_slice %19 {offsets = [256, 0], sizes = [128, 128], strides = [1, 1]} : vector<640x128xf32> to vector<128x128xf32>
    %cst_16 = arith.constant dense<0.000000e+00> : vector<2x128xf32>
    %26 = tpu.matmul %13, %25, %cst_16 {dimension_numbers = #tpu.dot_dimension_numbers<[1], [0], [0], [1], [0, 0, 1, 1], [], []>} : vector<2x128xf32>, vector<128x128xf32>, vector<2x128xf32> -> vector<2x128xf32>
    %27 = arith.addf %24, %26 : vector<2x128xf32>
    %28 = vector.extract_strided_slice %19 {offsets = [384, 0], sizes = [128, 128], strides = [1, 1]} : vector<640x128xf32> to vector<128x128xf32>
    %cst_17 = arith.constant dense<0.000000e+00> : vector<2x128xf32>
    %29 = tpu.matmul %14, %28, %cst_17 {dimension_numbers = #tpu.dot_dimension_numbers<[1], [0], [0], [1], [0, 0, 1, 1], [], []>} : vector<2x128xf32>, vector<128x128xf32>, vector<2x128xf32> -> vector<2x128xf32>
    %30 = arith.addf %27, %29 : vector<2x128xf32>
    %31 = vector.extract_strided_slice %19 {offsets = [512, 0], sizes = [128, 128], strides = [1, 1]} : vector<640x128xf32> to vector<128x128xf32>
    %cst_18 = arith.constant dense<0.000000e+00> : vector<2x128xf32>
    %32 = tpu.matmul %18, %31, %cst_18 {dimension_numbers = #tpu.dot_dimension_numbers<[1], [0], [0], [1], [0, 0, 1, 1], [], []>} : vector<2x128xf32>, vector<128x128xf32>, vector<2x128xf32> -> vector<2x128xf32>
    %33 = arith.addf %30, %32 : vector<2x128xf32>
    %c0_19 = arith.constant 0 : index
    %c0_20 = arith.constant 0 : index
    %34 = vector.load %arg7[%c0_19, %c0_20] : memref<2x128xf32, #tpu.memory_space<vmem>>, vector<2x128xf32>
    tpu.vector_store %arg7[%c0_19, %c0_20], %33 {strides = array<i32>} : memref<2x128xf32, #tpu.memory_space<vmem>>, vector<2x128xf32>,
    return
  }
  func.func @transform_0(%arg0: i32) -> (i32, i32) {
    %c0_i32 = arith.constant 0 : i32
    %c0_i32_0 = arith.constant 0 : i32
    return %arg0, %c0_i32 : i32, i32
  }
  func.func @transform_1(%arg0: i32) -> (i32, i32) {
    %c0_i32 = arith.constant 0 : i32
    %c0_i32_0 = arith.constant 0 : i32
    %c0_i32_1 = arith.constant 0 : i32
    return %c0_i32, %c0_i32_0 : i32, i32
  }
  func.func @transform_2(%arg0: i32) -> (i32, i32) {
    %c0_i32 = arith.constant 0 : i32
    %c0_i32_0 = arith.constant 0 : i32
    %c0_i32_1 = arith.constant 0 : i32
    return %c0_i32, %c0_i32_0 : i32, i32
  }
  func.func @transform_3(%arg0: i32) -> (i32, i32) {
    %c0_i32 = arith.constant 0 : i32
    %c0_i32_0 = arith.constant 0 : i32
    %c0_i32_1 = arith.constant 0 : i32
    return %c0_i32, %c0_i32_0 : i32, i32
  }
  func.func @transform_4(%arg0: i32) -> (i32, i32) {
    %c0_i32 = arith.constant 0 : i32
    %c0_i32_0 = arith.constant 0 : i32
    %c0_i32_1 = arith.constant 0 : i32
    return %c0_i32, %c0_i32_0 : i32, i32
  }
  func.func @transform_5(%arg0: i32) -> (i32, i32) {
    %c0_i32 = arith.constant 0 : i32
    %c0_i32_0 = arith.constant 0 : i32
    %c0_i32_1 = arith.constant 0 : i32
    return %c0_i32, %c0_i32_0 : i32, i32
  }
  func.func @transform_6(%arg0: i32) -> (i32, i32) {
    %c0_i32 = arith.constant 0 : i32
    %c0_i32_0 = arith.constant 0 : i32
    return %arg0, %c0_i32 : i32, i32
  }
}

</mosaic_0001>

<bundles_post_ra>
// kernel: tpu_custom_call.1
= control target key start
LH: loop header
LB: loop body
LE: loop exit
PB: predicated region body
PF: predicated region fallthrough
CT: control target
= control target key end

     0   :  { %11 = vsyncpa [#allocation3], 0  ;;  %s2308_s0 = inlined_call_operand.hbm [shape: f32[2,1024], index: 0, kind: input, shape index: {}]   ;;  %s2309_s1 = inlined_call_operand.hbm [shape: f32[1024,128], index: 1, kind: input, shape index: {}]   ;;  %s2310_s2 = inlined_call_operand.vmem [shape: f32[1,128], index: 2, kind: input, shape index: {}]   ;;  %s2311_s3 = inlined_call_operand.hbm [shape: f32[128,256], index: 3, kind: input, shape index: {}]   ;;  %s2312_s4 = inlined_call_operand.vmem [shape: f32[1,256], index: 4, kind: input, shape index: {}]   ;;  %s2313_s5 = inlined_call_operand.hbm [shape: f32[640,128], index: 5, kind: input, shape index: {}]   ;;  %s2314_s6 = inlined_call_operand.hbm [shape: f32[2,128], index: 6, kind: output, shape index: {}]  }
   0x1   :  { %12 = vsyncpa [#allocation6], 0 }
   0x2   :  { %13 = vsyncpa [#allocation9], 0 }
   0x3   :  { %14 = vsyncpa [#allocation4], 0  ;;  %s2075_s21 = smov [#allocation5]   ;;  %s1957_s25 = scalar_lea.hbm %s2309_s1, 16384 }
   0x4   :  { %s30_s22 = sshll.u32 %s2075_s21, 4  ;;  %p1958_p0 = scmp.ne.s32.totalorder %s2309_s1, %s1957_s25  ;;  %s31_s22 = int_to_ptr.vmem [resolvable:$true] %s30_s22 }
   0x5   :  { %p1961_p1 = scmp.lt.u32.totalorder %s1957_s25, %s2309_s1 }
   0x7   :  { %p1963_p2 = pnand %p1961_p1, %p1958_p0 }
   0x9   :  { %1966 = shalt.err (!%p1963_p2)
}
   0xa   :  { %s1967_s30 = scalar_lea.vmem %s31_s22, 16384  ;;  %p1972_p4 = scmp.lt.s32.totalorder %s31_s22, %s31_s22 }
   0xb   :  { %p1968_p3 = scmp.ne.s32.totalorder %s31_s22, %s1967_s30  ;;  %p1973_p5 = scmp.lt.s32.totalorder %s1967_s30, %s1967_s30 }
   0xd   :  { %p1974_p6 = por %p1973_p5, %p1972_p4 }
   0xf   :  { %p1975_p7 = pnand %p1974_p6, %p1968_p3 }
  0x11   :  { %1978 = shalt.err (!%p1975_p7)
}
  0x12   :  { %s2076_s7 = smov 128   ;;  %s2077_s8 = smov 8  }
  0x13   :  { %36 = dma.hbm_to_vmem [thread:$0]  %s2309_s1, 16384, %s31_s22, [#allocation6], %s2076_s7, %s2076_s7, %s2077_s8  }
  0x14   :  { %s2078_s11 = smov [#allocation2]   ;;  %s2079_s13 = smov [#allocation7]  }
  0x15   :  { %s21_s12 = sshll.u32 %s2078_s11, 4  ;;  %s44_s14 = sshll.u32 %s2079_s13, 4  ;;  %s22_s12 = int_to_ptr.vmem [resolvable:$true] %s21_s12  ;;  %s45_s14 = int_to_ptr.vmem [resolvable:$true] %s44_s14 }
  0x16   :  { %s1979_s17 = scalar_lea.hbm %s2308_s0, 256 }
  0x17   :  { %p1980_p8 = scmp.ne.s32.totalorder %s2308_s0, %s1979_s17  ;;  %p1983_p9 = scmp.lt.u32.totalorder %s1979_s17, %s2308_s0 }
  0x19   :  { %p1985_p10 = pnand %p1983_p9, %p1980_p8 }
  0x1b   :  { %1988 = shalt.err (!%p1985_p10)
}
  0x1c   :  { %s1989_s1 = scalar_lea.vmem %s22_s12, 256  ;;  %p1994_p12 = scmp.lt.s32.totalorder %s22_s12, %s22_s12 }
  0x1d   :  { %p1990_p11 = scmp.ne.s32.totalorder %s22_s12, %s1989_s1  ;;  %p1995_p13 = scmp.lt.s32.totalorder %s1989_s1, %s1989_s1 }
  0x1f   :  { %p1996_p0 = por %p1995_p13, %p1994_p12 }
  0x21   :  { %p1997_p1 = pnand %p1996_p0, %p1990_p11 }
  0x23   :  { %2000 = shalt.err (!%p1997_p1)
}
  0x24   :  { %24 = dma.hbm_to_vmem [thread:$0]  %s2308_s0, 256, %s22_s12, [#allocation3]  }
  0x25   :  { %s2001_s26 = scalar_lea.hbm %s2311_s3, 4096 }
  0x26   :  { %p2002_p2 = scmp.ne.s32.totalorder %s2311_s3, %s2001_s26  ;;  %p2005_p3 = scmp.lt.u32.totalorder %s2001_s26, %s2311_s3 }
  0x28   :  { %p2007_p4 = pnand %p2005_p3, %p2002_p2 }
  0x2a   :  { %2010 = shalt.err (!%p2007_p4)
}
  0x2b   :  { %s2011_s9 = scalar_lea.vmem %s45_s14, 4096  ;;  %p2016_p6 = scmp.lt.s32.totalorder %s45_s14, %s45_s14 }
  0x2c   :  { %p2012_p5 = scmp.ne.s32.totalorder %s45_s14, %s2011_s9  ;;  %p2017_p7 = scmp.lt.s32.totalorder %s2011_s9, %s2011_s9 }
  0x2e   :  { %p2018_p8 = por %p2017_p7, %p2016_p6 }
  0x30   :  { %p2019_p9 = pnand %p2018_p8, %p2012_p5 }
  0x32   :  { %2022 = shalt.err (!%p2019_p9)
}
  0x33   :  { %s2080_s0 = smov 256   ;;  %s2081_s10 = smov 16  }
  0x34   :  { %50 = dma.hbm_to_vmem [thread:$0]  %s2311_s3, 4096, %s45_s14, [#allocation6], %s2080_s0, %s2080_s0, %s2081_s10  }
  0x35   :  { %s2082_s13 = smov [#allocation8]   ;;  %s2023_s18 = scalar_lea.hbm %s2313_s5, 10240 }
  0x36   :  { %s58_s15 = sshll.u32 %s2082_s13, 4  ;;  %p2024_p10 = scmp.ne.s32.totalorder %s2313_s5, %s2023_s18  ;;  %s59_s15 = int_to_ptr.vmem [resolvable:$true] %s58_s15 }
  0x37   :  { %p2027_p11 = scmp.lt.u32.totalorder %s2023_s18, %s2313_s5 }
  0x39   :  { %p2029_p12 = pnand %p2027_p11, %p2024_p10 }
  0x3b   :  { %2032 = shalt.err (!%p2029_p12)
}
  0x3c   :  { %s2033_s22 = scalar_lea.vmem %s59_s15, 10240  ;;  %p2038_p0 = scmp.lt.s32.totalorder %s59_s15, %s59_s15 }
  0x3d   :  { %p2034_p13 = scmp.ne.s32.totalorder %s59_s15, %s2033_s22  ;;  %p2039_p1 = scmp.lt.s32.totalorder %s2033_s22, %s2033_s22 }
  0x3f   :  { %p2040_p2 = por %p2039_p1, %p2038_p0 }
  0x41   :  { %p2041_p3 = pnand %p2040_p2, %p2034_p13 }
  0x43   :  { %2044 = shalt.err (!%p2041_p3)
}
  0x44   :  { %64 = dma.hbm_to_vmem [thread:$0]  %s2313_s5, 10240, %s59_s15, [#allocation9], %s2076_s7, %s2076_s7, %s2077_s8  }
  0x45   :  { %2067 = dma.done.wait [#allocation3], 256  }
  0x46   :  { %2068 = vsyncadd [#allocation3], 4294967040 }
  0x47   :  { %2069 = dma.done.wait [#allocation6], 20480  }
  0x48   :  { %2070 = vsyncadd [#allocation6], 4294946816 }
  0x49   :  { %2071 = dma.done.wait [#allocation9], 10240  }
  0x4a   :  { %2072 = vsyncadd [#allocation9], 4294957056  ;;  %v2083_v0 = vmov 1983009808   ;;  %v253_v2 = vlaneseq  ;;  %v129_v3 = vld [vmem:[#allocation5 + $0x80] sm:$0xff]  ;;  %v130_v4 = vld [vmem:[#allocation5 + $0x88] sm:$0xff] }
  0x4b   :  { %v251_v1 = vunpack.c.l.s4 %v2083_v0  ;;  %v113_v5 = vld [vmem:[#allocation5] sm:$0xff]  ;;  %v1630_v6 = vpack.c.bf16 %v130_v4, %v129_v3  ;;  %v114_v7 = vld [vmem:[#allocation5 + $0x8] sm:$0xff]  ;;  %v131_v8 = vld [vmem:[#allocation5 + $0x90] sm:$0xff]  ;;  %vm2086_vm0 = vmmov 0  }
  0x4c   :  { %v132_v9 = vld [vmem:[#allocation5 + $0x98] sm:$0xff]  ;;  %v1632_v10 = vpack.c.bf16 %v114_v7, %v113_v5  ;;  %v115_v12 = vld [vmem:[#allocation5 + $0x10] sm:$0xff]  ;;  %v133_v14 = vld [vmem:[#allocation5 + $0xa0] sm:$0xff]  ;;  %v2177_v17 = vshrl.u32 %v253_v2, 7 }
  0x4d   :  { %v1634_v11 = vpack.c.bf16 %v132_v9, %v131_v8  ;;  %v116_v13 = vld [vmem:[#allocation5 + $0x18] sm:$0xff]  ;;  %1631 = vmatprep.subr.bf16.mxu1 %v1630_v6  ;;  %v134_v15 = vld [vmem:[#allocation5 + $0xa8] sm:$0xff]  ;;  %v252_v16 = vunpack.c.0.s8 %v251_v1  ;;  %v117_v20 = vld [vmem:[#allocation5 + $0x20] sm:$0xff] }
  0x4e   :  { %1633 = vmatpush3.bf16.msra.mxu1 %v1632_v10  ;;  %v1636_v18 = vpack.c.bf16 %v116_v13, %v115_v12  ;;  %v1638_v19 = vpack.c.bf16 %v134_v15, %v133_v14  ;;  %v118_v21 = vld [vmem:[#allocation5 + $0x28] sm:$0xff]  ;;  %v135_v22 = vld [vmem:[#allocation5 + $0xb0] sm:$0xff]  ;;  %v136_v23 = vld [vmem:[#allocation5 + $0xb8] sm:$0xff] }
  0x4f   :  { %1635 = vmatprep.subr.bf16.mxu1 %v1634_v11  ;;  %v2180_v24 = vsub.s32 %v252_v16, %v2177_v17  ;;  %v1640_v25 = vpack.c.bf16 %v118_v21, %v117_v20  ;;  %v1642_v26 = vpack.c.bf16 %v136_v23, %v135_v22  ;;  %v119_v27 = vld [vmem:[#allocation5 + $0x30] sm:$0xff]  ;;  %v120_v28 = vld [vmem:[#allocation5 + $0x38] sm:$0xff]  ;;  %v137_v29 = vld [vmem:[#allocation5 + $0xc0] sm:$0xff] }
  0x50   :  { %v138_v30 = vld [vmem:[#allocation5 + $0xc8] sm:$0xff]  ;;  %v111_v31 = vld [vmem:[#allocation2] sm:$0xff]  ;;  %v1644_v33 = vpack.c.bf16 %v120_v28, %v119_v27  ;;  %v121_v35 = vld [vmem:[#allocation5 + $0x40] sm:$0xff] }
  0x51   :  { %v256_v32 = vrot.slane %v111_v31, %v2180_v24  ;;  %v1646_v34 = vpack.c.bf16 %v138_v30, %v137_v29  ;;  %v122_v36 = vld [vmem:[#allocation5 + $0x48] sm:$0xff]  ;;  %v139_v38 = vld [vmem:[#allocation5 + $0xd0] sm:$0xff]  ;;  %v140_v39 = vld [vmem:[#allocation5 + $0xd8] sm:$0xff]  ;;  %v249_v53 = vcombine.high %v111_v31, %v111_v31 }
  0x52   :  { %1637 = vmatpush3.bf16.msra.mxu1 %v1636_v18  ;;  %v1648_v40 = vpack.c.bf16 %v122_v36, %v121_v35  ;;  %v1650_v41 = vpack.c.bf16 %v140_v39, %v139_v38  ;;  %v123_v42 = vld [vmem:[#allocation5 + $0x50] sm:$0xff]  ;;  %v124_v43 = vld [vmem:[#allocation5 + $0x58] sm:$0xff]  ;;  %v141_v44 = vld [vmem:[#allocation5 + $0xe0] sm:$0xff] }
  0x53   :  { %1639 = vmatprep.subr.bf16.mxu1 %v1638_v19  ;;  %v264_v37 = vcombine.high %v256_v32, %v256_v32  ;;  %v142_v45 = vld [vmem:[#allocation5 + $0xe8] sm:$0xff]  ;;  %v1652_v46 = vpack.c.bf16 %v124_v43, %v123_v42  ;;  %v125_v48 = vld [vmem:[#allocation5 + $0x60] sm:$0xff]  ;;  %v143_v50 = vld [vmem:[#allocation5 + $0xf0] sm:$0xff]  ;;  %v2184_v60 = vrot.slane %v249_v53, %v2180_v24 }
  0x54   :  { %v1654_v47 = vpack.c.bf16 %v142_v45, %v141_v44  ;;  %v126_v49 = vld [vmem:[#allocation5 + $0x68] sm:$0xff]  ;;  %v144_v51 = vld [vmem:[#allocation5 + $0xf8] sm:$0xff]  ;;  %v127_v55 = vld [vmem:[#allocation5 + $0x70] sm:$0xff] }
  0x55   :  { %355 = vmatprep.mubr.f32.mxu1 %v264_v37  ;;  %v1656_v52 = vpack.c.bf16 %v126_v49, %v125_v48  ;;  %v1658_v54 = vpack.c.bf16 %v144_v51, %v143_v50  ;;  %v128_v56 = vld [vmem:[#allocation5 + $0x78] sm:$0xff]  ;;  %v161_v57 = vld [vmem:[#allocation5 + $0x180] sm:$0xff]  ;;  %v162_v58 = vld [vmem:[#allocation5 + $0x188] sm:$0xff]  ;;  %v265_v3 = vcombine.high %v2184_v60, %v2184_v60 }
  0x56   :  { %1641 = vmatpush3.bf16.msra.mxu1 %v1640_v25  ;;  %v1660_v59 = vpack.c.bf16 %v128_v56, %v127_v55  ;;  %v1662_v61 = vpack.c.bf16 %v162_v58, %v161_v57  ;;  %v145_v62 = vld [vmem:[#allocation5 + $0x100] sm:$0xff]  ;;  %v146_v63 = vld [vmem:[#allocation5 + $0x108] sm:$0xff]  ;;  %v163_v0 = vld [vmem:[#allocation5 + $0x190] sm:$0xff] }
  0x57   :  { %1643 = vmatprep.subr.bf16.mxu1 %v1642_v26  ;;  %v164_v1 = vld [vmem:[#allocation5 + $0x198] sm:$0xff]  ;;  %v1664_v2 = vpack.c.bf16 %v146_v63, %v145_v62  ;;  %v147_v5 = vld [vmem:[#allocation5 + $0x110] sm:$0xff]  ;;  %v165_v7 = vld [vmem:[#allocation5 + $0x1a0] sm:$0xff] }
  0x58   :  { %v1666_v4 = vpack.c.bf16 %v164_v1, %v163_v0  ;;  %v148_v6 = vld [vmem:[#allocation5 + $0x118] sm:$0xff]  ;;  %v166_v8 = vld [vmem:[#allocation5 + $0x1a8] sm:$0xff]  ;;  %v149_v11 = vld [vmem:[#allocation5 + $0x120] sm:$0xff] }
  0x59   :  { %v1668_v9 = vpack.c.bf16 %v148_v6, %v147_v5  ;;  %v1670_v10 = vpack.c.bf16 %v166_v8, %v165_v7  ;;  %v150_v12 = vld [vmem:[#allocation5 + $0x128] sm:$0xff]  ;;  %v167_v13 = vld [vmem:[#allocation5 + $0x1b0] sm:$0xff]  ;;  %v168_v14 = vld [vmem:[#allocation5 + $0x1b8] sm:$0xff] }
  0x5a   :  { %1645 = vmatpush3.bf16.msra.mxu1 %v1644_v33  ;;  %v1672_v15 = vpack.c.bf16 %v150_v12, %v149_v11  ;;  %v1674_v16 = vpack.c.bf16 %v168_v14, %v167_v13  ;;  %v151_v18 = vld [vmem:[#allocation5 + $0x130] sm:$0xff]  ;;  %v152_v19 = vld [vmem:[#allocation5 + $0x138] sm:$0xff]  ;;  %v169_v20 = vld [vmem:[#allocation5 + $0x1c0] sm:$0xff] }
  0x5b   :  { %1647 = vmatprep.subr.bf16.mxu1 %v1646_v34  ;;  %v170_v21 = vld [vmem:[#allocation5 + $0x1c8] sm:$0xff]  ;;  %v1676_v22 = vpack.c.bf16 %v152_v19, %v151_v18  ;;  %v153_v25 = vld [vmem:[#allocation5 + $0x140] sm:$0xff]  ;;  %v171_v27 = vld [vmem:[#allocation5 + $0x1d0] sm:$0xff] }
  0x5c   :  { %v1678_v23 = vpack.c.bf16 %v170_v21, %v169_v20  ;;  %v154_v26 = vld [vmem:[#allocation5 + $0x148] sm:$0xff]  ;;  %v172_v28 = vld [vmem:[#allocation5 + $0x1d8] sm:$0xff]  ;;  %v155_v31 = vld [vmem:[#allocation5 + $0x150] sm:$0xff] }
  0x5d   :  { %v1680_v29 = vpack.c.bf16 %v154_v26, %v153_v25  ;;  %v1682_v30 = vpack.c.bf16 %v172_v28, %v171_v27  ;;  %v173_v33 = vld [vmem:[#allocation5 + $0x1e0] sm:$0xff]  ;;  %v174_v34 = vld [vmem:[#allocation5 + $0x1e8] sm:$0xff]  ;;  %v175_v39 = vld [vmem:[#allocation5 + $0x1f0] sm:$0xff] }
  0x5e   :  { %1649 = vmatpush3.bf16.msra.mxu1 %v1648_v40  ;;  %v1686_v36 = vpack.c.bf16 %v174_v34, %v173_v33  ;;  %v157_v37 = vld [vmem:[#allocation5 + $0x160] sm:$0xff]  ;;  %v158_v38 = vld [vmem:[#allocation5 + $0x168] sm:$0xff]  ;;  %v176_v40 = vld [vmem:[#allocation5 + $0x1f8] sm:$0xff] }
  0x5f   :  { %1651 = vmatprep.subr.bf16.mxu1 %v1650_v41  ;;  %v1688_v41 = vpack.c.bf16 %v158_v38, %v157_v37  ;;  %v1690_v42 = vpack.c.bf16 %v176_v40, %v175_v39  ;;  %v159_v43 = vld [vmem:[#allocation5 + $0x170] sm:$0xff]  ;;  %v160_v44 = vld [vmem:[#allocation5 + $0x178] sm:$0xff]  ;;  %v177_v51 = vld [vmem:[#allocation5 + $0x200] sm:$0xff] }
  0x60   :  { %v2188_v45 = vld [vmem:[#allocation2 + $0x8] sm:$0xff]  ;;  %v1692_v48 = vpack.c.bf16 %v160_v44, %v159_v43  ;;  %v195_v53 = vld [vmem:[#allocation5 + $0x290] sm:$0xff]  ;;  %v198_v62 = vld [vmem:[#allocation5 + $0x2a8] sm:$0xff] }
  0x61   :  { %v2192_v49 = vrot.slane %v2188_v45, %v2180_v24  ;;  %v179_v58 = vld [vmem:[#allocation5 + $0x210] sm:$0xff]  ;;  %v181_v1 = vld [vmem:[#allocation5 + $0x220] sm:$0xff]  ;;  %v184_v8 = vld [vmem:[#allocation5 + $0x238] sm:$0xff] }
  0x62   :  { %1653 = vmatpush3.bf16.msra.mxu1 %v1652_v46  ;;  %v193_v46 = vld [vmem:[#allocation5 + $0x280] sm:$0xff]  ;;  %v183_v7 = vld [vmem:[#allocation5 + $0x230] sm:$0xff]  ;;  %v186_v13 = vld [vmem:[#allocation5 + $0x248] sm:$0xff] }
  0x63   :  { %1655 = vmatprep.subr.bf16.mxu1 %v1654_v47  ;;  %v194_v47 = vld [vmem:[#allocation5 + $0x288] sm:$0xff]  ;;  %v281_v56 = vcombine.high %v2192_v49, %v2192_v49  ;;  %v1708_v11 = vpack.c.bf16 %v184_v8, %v183_v7  ;;  %v185_v12 = vld [vmem:[#allocation5 + $0x240] sm:$0xff]  ;;  %v203_v14 = vld [vmem:[#allocation5 + $0x2d0] sm:$0xff] }
  0x64   :  { %v1694_v50 = vpack.c.bf16 %v194_v47, %v193_v46  ;;  %v187_v19 = vld [vmem:[#allocation5 + $0x250] sm:$0xff]  ;;  %v188_v20 = vld [vmem:[#allocation5 + $0x258] sm:$0xff]  ;;  %v205_v21 = vld [vmem:[#allocation5 + $0x2e0] sm:$0xff] }
  0x65   :  { %v189_v26 = vld [vmem:[#allocation5 + $0x260] sm:$0xff]  ;;  %v190_v27 = vld [vmem:[#allocation5 + $0x268] sm:$0xff]  ;;  %v207_v28 = vld [vmem:[#allocation5 + $0x2f0] sm:$0xff] }
  0x66   :  { %1657 = vmatpush3.bf16.msra.mxu1 %v1656_v52  ;;  %v178_v52 = vld [vmem:[#allocation5 + $0x208] sm:$0xff]  ;;  %v191_v33 = vld [vmem:[#allocation5 + $0x270] sm:$0xff]  ;;  %v192_v34 = vld [vmem:[#allocation5 + $0x278] sm:$0xff] }
  0x67   :  { %1659 = vmatprep.subr.bf16.mxu1 %v1658_v54  ;;  %v196_v54 = vld [vmem:[#allocation5 + $0x298] sm:$0xff]  ;;  %v1696_v55 = vpack.c.bf16 %v178_v52, %v177_v51  ;;  %v1724_v37 = vpack.c.bf16 %v192_v34, %v191_v33  ;;  %v209_v40 = vld [vmem:[#allocation5 + $0x300] sm:$0xff]  ;;  %v211_v47 = vld [vmem:[#allocation5 + $0x310] sm:$0xff] }
  0x68   :  { %v1698_v57 = vpack.c.bf16 %v196_v54, %v195_v53  ;;  %v228_v43 = vld [vmem:[#allocation5 + $0x398] sm:$0xff]  ;;  %v230_v51 = vld [vmem:[#allocation5 + $0x3a8] sm:$0xff]  ;;  %v213_v53 = vld [vmem:[#allocation5 + $0x320] sm:$0xff] }
  0x69   :  { %v214_v54 = vld [vmem:[#allocation5 + $0x328] sm:$0xff]  ;;  %v219_v7 = vld [vmem:[#allocation5 + $0x350] sm:$0xff]  ;;  %v220_v8 = vld [vmem:[#allocation5 + $0x358] sm:$0xff] }
  0x6a   :  { %1661 = vmatpush3.bf16.msra.mxu1 %v1660_v59  ;;  %v180_v59 = vld [vmem:[#allocation5 + $0x218] sm:$0xff]  ;;  %v84_v33 = vld [vmem:[#allocation7 + $0x30] sm:$0xff]  ;;  %v87_v34 = vld [vmem:[#allocation7 + $0x48] sm:$0xff] }
  0x6b   :  { %1663 = vmatprep.subr.bf16.mxu1 %v1662_v61  ;;  %v197_v61 = vld [vmem:[#allocation5 + $0x2a0] sm:$0xff]  ;;  %v1700_v63 = vpack.c.bf16 %v180_v59, %v179_v58  ;;  %v215_v59 = vld [vmem:[#allocation5 + $0x330] sm:$0xff] }
  0x6c   :  { %v1702_v0 = vpack.c.bf16 %v198_v62, %v197_v61  ;;  %v216_v61 = vld [vmem:[#allocation5 + $0x338] sm:$0xff]  ;;  %v233_v62 = vld [vmem:[#allocation5 + $0x3c0] sm:$0xff] }
  0x6d   :  { %356 = vmatmul.mubr.f32.vlgmr.msra.gmra.mrb[0].mxu1 %v256_v32  ;;  %v156_v32 = vld [vmem:[#allocation5 + $0x158] sm:$0xff] }
  0x6e   :  { %1665 = vmatpush3.bf16.msra.mxu1 %v1664_v2  ;;  %425 = vmatprep.mubr.f32.mxu1 %v265_v3  ;;  %v1684_v35 = vpack.c.bf16 %v156_v32, %v155_v31  ;;  %v182_v2 = vld [vmem:[#allocation5 + $0x228] sm:$0xff]  ;;  %v199_v3 = vld [vmem:[#allocation5 + $0x2b0] sm:$0xff]  ;;  %v266_v31 = vcombine.high %v2188_v45, %v2188_v45 }
  0x6f   :  { %1667 = vmatprep.subr.bf16.mxu1 %v1666_v4  ;;  %v200_v4 = vld [vmem:[#allocation5 + $0x2b8] sm:$0xff]  ;;  %v1704_v5 = vpack.c.bf16 %v182_v2, %v181_v1  ;;  %v217_v1 = vld [vmem:[#allocation5 + $0x340] sm:$0xff]  ;;  %v218_v2 = vld [vmem:[#allocation5 + $0x348] sm:$0xff] }
  0x70   :  { %v1706_v6 = vpack.c.bf16 %v200_v4, %v199_v3  ;;  %v2200_v38 = vrot.slane %v266_v31, %v2180_v24  ;;  %v235_v3 = vld [vmem:[#allocation5 + $0x3d0] sm:$0xff]  ;;  %v236_v4 = vld [vmem:[#allocation5 + $0x3d8] sm:$0xff] }
  0x72   :  { %1669 = vmatpush3.bf16.msra.mxu1 %v1668_v9  ;;  %v201_v9 = vld [vmem:[#allocation5 + $0x2c0] sm:$0xff]  ;;  %v282_v45 = vcombine.high %v2200_v38, %v2200_v38 }
  0x73   :  { %1671 = vmatprep.subr.bf16.mxu1 %v1670_v10  ;;  %v202_v10 = vld [vmem:[#allocation5 + $0x2c8] sm:$0xff] }
  0x76   :  { %1673 = vmatpush3.bf16.msra.mxu1 %v1672_v15  ;;  %v204_v15 = vld [vmem:[#allocation5 + $0x2d8] sm:$0xff] }
  0x77   :  { %1675 = vmatprep.subr.bf16.mxu1 %v1674_v16  ;;  %v1712_v16 = vpack.c.bf16 %v186_v13, %v185_v12  ;;  %v1714_v18 = vpack.c.bf16 %v204_v15, %v203_v14  ;;  %v221_v12 = vld [vmem:[#allocation5 + $0x360] sm:$0xff]  ;;  %v222_v13 = vld [vmem:[#allocation5 + $0x368] sm:$0xff]  ;;  %v239_v14 = vld [vmem:[#allocation5 + $0x3f0] sm:$0xff] }
  0x78   :  { %v240_v15 = vld [vmem:[#allocation5 + $0x3f8] sm:$0xff] }
  0x7a   :  { %1677 = vmatpush3.bf16.msra.mxu1 %v1676_v22  ;;  %v206_v22 = vld [vmem:[#allocation5 + $0x2e8] sm:$0xff] }
  0x7b   :  { %1679 = vmatprep.subr.bf16.mxu1 %v1678_v23  ;;  %v1716_v23 = vpack.c.bf16 %v188_v20, %v187_v19  ;;  %v1718_v25 = vpack.c.bf16 %v206_v22, %v205_v21  ;;  %v223_v19 = vld [vmem:[#allocation5 + $0x370] sm:$0xff]  ;;  %v224_v20 = vld [vmem:[#allocation5 + $0x378] sm:$0xff]  ;;  %v79_v22 = vld [vmem:[#allocation7 + $0x8] sm:$0xff] }
  0x7c   :  { %v1756_v21 = vpack.c.bf16 %v224_v20, %v223_v19 }
  0x7e   :  { %1681 = vmatpush3.bf16.msra.mxu1 %v1680_v29  ;;  %v208_v29 = vld [vmem:[#allocation5 + $0x2f8] sm:$0xff] }
  0x7f   :  { %1683 = vmatprep.subr.bf16.mxu1 %v1682_v30  ;;  %v1720_v30 = vpack.c.bf16 %v190_v27, %v189_v26  ;;  %v1722_v32 = vpack.c.bf16 %v208_v29, %v207_v28  ;;  %v80_v27 = vld [vmem:[#allocation7 + $0x10] sm:$0xff]  ;;  %v83_v28 = vld [vmem:[#allocation7 + $0x28] sm:$0xff]  ;;  %v85_v29 = vld [vmem:[#allocation7 + $0x38] sm:$0xff] }
  0x80   :  { %v1762_v31 = vpack.c.bf16 %v85_v29, %v83_v28 }
  0x82   :  { %1685 = vmatpush3.bf16.msra.mxu1 %v1684_v35  ;;  %v225_v35 = vld [vmem:[#allocation5 + $0x380] sm:$0xff] }
  0x83   :  { %1687 = vmatprep.subr.bf16.mxu1 %v1686_v36  ;;  %v226_v36 = vld [vmem:[#allocation5 + $0x388] sm:$0xff] }
  0x84   :  { %v1726_v39 = vpack.c.bf16 %v226_v36, %v225_v35  ;;  %v89_v35 = vld [vmem:[#allocation7 + $0x58] sm:$0xff] }
  0x86   :  { %1689 = vmatpush3.bf16.msra.mxu1 %v1688_v41  ;;  %v210_v41 = vld [vmem:[#allocation5 + $0x308] sm:$0xff] }
  0x87   :  { %1691 = vmatprep.subr.bf16.mxu1 %v1690_v42  ;;  %v227_v42 = vld [vmem:[#allocation5 + $0x390] sm:$0xff]  ;;  %v1728_v44 = vpack.c.bf16 %v210_v41, %v209_v40  ;;  %v91_v40 = vld [vmem:[#allocation7 + $0x68] sm:$0xff]  ;;  %v93_v41 = vld [vmem:[#allocation7 + $0x78] sm:$0xff] }
  0x88   :  { %v1730_v46 = vpack.c.bf16 %v228_v43, %v227_v42  ;;  %v1770_v43 = vpack.c.bf16 %v93_v41, %v91_v40  ;;  %v750_v40 = vld [vmem:[#allocation8 + $0xc0] sm:$0xff]  ;;  %v751_v41 = vld [vmem:[#allocation8 + $0xc8] sm:$0xff] }
  0x8a   :  { %1693 = vmatpush3.bf16.msra.mxu1 %v1692_v48  ;;  %v212_v48 = vld [vmem:[#allocation5 + $0x318] sm:$0xff] }
  0x8b   :  { %1695 = vmatprep.subr.bf16.mxu1 %v1694_v50  ;;  %v229_v50 = vld [vmem:[#allocation5 + $0x3a0] sm:$0xff]  ;;  %v1732_v24 = vpack.c.bf16 %v212_v48, %v211_v47  ;;  %v97_v47 = vld [vmem:[#allocation7 + $0x98] sm:$0xff] }
  0x8c   :  { %v1734_v52 = vpack.c.bf16 %v230_v51, %v229_v50  ;;  %v94_v51 = vld [vmem:[#allocation7 + $0x80] sm:$0xff] }
  0x8d   :  { %426 = vmatmul.mubr.f32.vlgmr.msra.gmra.mrb[2].mxu1 %v2184_v60  ;;  %v1710_v60 = vpack.c.bf16 %v202_v10, %v201_v9  ;;  %v237_v9 = vld [vmem:[#allocation5 + $0x3e0] sm:$0xff]  ;;  %v238_v10 = vld [vmem:[#allocation5 + $0x3e8] sm:$0xff] }
  0x8e   :  { %1697 = vmatpush3.bf16.msra.mxu1 %v1696_v55  ;;  %495 = vmatprep.mubr.f32.mxu1 %v281_v56  ;;  %v231_v55 = vld [vmem:[#allocation5 + $0x3b0] sm:$0xff]  ;;  %v232_v56 = vld [vmem:[#allocation5 + $0x3b8] sm:$0xff] }
  0x8f   :  { %1699 = vmatprep.subr.bf16.mxu1 %v1698_v57  ;;  %v1736_v57 = vpack.c.bf16 %v214_v54, %v213_v53  ;;  %v1738_v58 = vpack.c.bf16 %v232_v56, %v231_v55  ;;  %v101_v53 = vld [vmem:[#allocation7 + $0xb8] sm:$0xff]  ;;  %v98_v56 = vld [vmem:[#allocation7 + $0xa0] sm:$0xff] }
  0x92   :  { %1701 = vmatpush3.bf16.msra.mxu1 %v1700_v63  ;;  %v234_v63 = vld [vmem:[#allocation5 + $0x3c8] sm:$0xff] }
  0x93   :  { %1703 = vmatprep.subr.bf16.mxu1 %v1702_v0  ;;  %v1740_v0 = vpack.c.bf16 %v216_v61, %v215_v59  ;;  %v103_v59 = vld [vmem:[#allocation7 + $0xc8] sm:$0xff]  ;;  %v105_v61 = vld [vmem:[#allocation7 + $0xd8] sm:$0xff] }
  0x96   :  { %1705 = vmatpush3.bf16.msra.mxu1 %v1704_v5  ;;  %v1744_v5 = vpack.c.bf16 %v218_v2, %v217_v1  ;;  %v107_v1 = vld [vmem:[#allocation7 + $0xe8] sm:$0xff]  ;;  %v109_v2 = vld [vmem:[#allocation7 + $0xf8] sm:$0xff] }
  0x97   :  { %1707 = vmatprep.subr.bf16.mxu1 %v1706_v6  ;;  %v1746_v6 = vpack.c.bf16 %v236_v4, %v235_v3  ;;  %v1786_v3 = vpack.c.bf16 %v109_v2, %v107_v1  ;;  %v106_v4 = vld [vmem:[#allocation7 + $0xe0] sm:$0xff]  ;;  %v731_v2 = vld [vmem:[#allocation8 + $0x28] sm:$0xff] }
  0x98   :  { %v730_v1 = vld [vmem:[#allocation8 + $0x20] sm:$0xff] }
  0x9a   :  { %1709 = vmatpush3.bf16.msra.mxu1 %v1708_v11  ;;  %v1748_v11 = vpack.c.bf16 %v220_v8, %v219_v7  ;;  %v2084_v7 = vmov 0.0   ;;  %v2085_v8 = vmov 0.0|0.0  }
  0x9b   :  { %1711 = vmatprep.subr.bf16.mxu1 %v1710_v60  ;;  %v1750_v60 = vpack.c.bf16 %v238_v10, %v237_v9  ;;  %647 = vmatprep.mubr.f32.mxu0 %v2084_v7 }
  0x9e   :  { %1713 = vmatpush3.bf16.msra.mxu1 %v1712_v16  ;;  %v1752_v16 = vpack.c.bf16 %v222_v13, %v221_v12 }
  0x9f   :  { %1715 = vmatprep.subr.bf16.mxu1 %v1714_v18  ;;  %v1754_v18 = vpack.c.bf16 %v240_v15, %v239_v14 }
  0xa2   :  { %1717 = vmatpush3.bf16.msra.mxu1 %v1716_v23  ;;  %v81_v23 = vld [vmem:[#allocation7 + $0x18] sm:$0xff] }
  0xa3   :  { %1719 = vmatprep.subr.bf16.mxu1 %v1718_v25  ;;  %v78_v25 = vld [vmem:[#allocation7] sm:$0xff]  ;;  %v2206_v26 = vpack.c.bf16 %v81_v23, %v79_v22 }
  0xa5   :  { %1759 = vmatprep.subr.bf16.mxu0 %v2206_v26 }
  0xa6   :  { %1721 = vmatpush3.bf16.msra.mxu1 %v1720_v30  ;;  %v1760_v30 = vpack.c.bf16 %v80_v27, %v78_v25  ;;  %v743_v27 = vld [vmem:[#allocation8 + $0x88] sm:$0xff] }
  0xa7   :  { %1723 = vmatprep.subr.bf16.mxu1 %v1722_v32  ;;  %v82_v32 = vld [vmem:[#allocation7 + $0x20] sm:$0xff] }
  0xa8   :  { %1761 = vmatpush1.bf16.msra.mxu0 %v1760_v30  ;;  %v1764_v36 = vpack.c.bf16 %v84_v33, %v82_v32  ;;  %v745_v32 = vld [vmem:[#allocation8 + $0x98] sm:$0xff] }
  0xa9   :  { %1763 = vmatprep.subr.bf16.mxu0 %v1762_v31 }
  0xaa   :  { %1725 = vmatpush3.bf16.msra.mxu1 %v1724_v37  ;;  %v1766_v37 = vpack.c.bf16 %v89_v35, %v87_v34  ;;  %v746_v34 = vld [vmem:[#allocation8 + $0xa0] sm:$0xff]  ;;  %v747_v35 = vld [vmem:[#allocation8 + $0xa8] sm:$0xff] }
  0xab   :  { %1727 = vmatprep.subr.bf16.mxu1 %v1726_v39  ;;  %v88_v39 = vld [vmem:[#allocation7 + $0x50] sm:$0xff] }
  0xac   :  { %1765 = vmatpush1.bf16.msra.mxu0 %v1764_v36  ;;  %v1821_v36 = vpack.c.bf16 %v747_v35, %v746_v34  ;;  %v767_v35 = vld [vmem:[#allocation8 + $0x148] sm:$0xff] }
  0xad   :  { %496 = vmatmul.mubr.f32.vlgmr.msra.gmra.mrb[4].mxu1 %v2192_v49  ;;  %v1742_v49 = vpack.c.bf16 %v234_v63, %v233_v62  ;;  %1767 = vmatprep.subr.bf16.mxu0 %v1766_v37  ;;  %v1782_v62 = vpack.c.bf16 %v105_v61, %v103_v59  ;;  %v102_v63 = vld [vmem:[#allocation7 + $0xc0] sm:$0xff] }
  0xae   :  { %1729 = vmatpush3.bf16.msra.mxu1 %v1728_v44  ;;  %565 = vmatprep.mubr.f32.mxu1 %v282_v45  ;;  %v90_v44 = vld [vmem:[#allocation7 + $0x60] sm:$0xff]  ;;  %v92_v45 = vld [vmem:[#allocation7 + $0x70] sm:$0xff] }
  0xaf   :  { %1731 = vmatprep.subr.bf16.mxu1 %v1730_v46  ;;  %v95_v46 = vld [vmem:[#allocation7 + $0x88] sm:$0xff]  ;;  %v1772_v48 = vpack.c.bf16 %v92_v45, %v90_v44  ;;  %v753_v44 = vld [vmem:[#allocation8 + $0xd8] sm:$0xff] }
  0xb0   :  { %v1774_v50 = vpack.c.bf16 %v97_v47, %v95_v46  ;;  %v754_v46 = vld [vmem:[#allocation8 + $0xe0] sm:$0xff]  ;;  %v755_v47 = vld [vmem:[#allocation8 + $0xe8] sm:$0xff] }
  0xb2   :  { %1733 = vmatpush3.bf16.msra.mxu1 %v1732_v24  ;;  %v96_v24 = vld [vmem:[#allocation7 + $0x90] sm:$0xff] }
  0xb3   :  { %1735 = vmatprep.subr.bf16.mxu1 %v1734_v52  ;;  %v99_v52 = vld [vmem:[#allocation7 + $0xa8] sm:$0xff]  ;;  %v1776_v54 = vpack.c.bf16 %v96_v24, %v94_v51  ;;  %v757_v51 = vld [vmem:[#allocation8 + $0xf8] sm:$0xff] }
  0xb4   :  { %v1778_v55 = vpack.c.bf16 %v101_v53, %v99_v52  ;;  %v575_v52 = vsub.s32 0, %v2177_v17  ;;  %v2242_v53 = vld [vmem:[%s2312_s4] sm:$0x3]  ;;  %s2087_s4 = smov [#allocation10]  }
  0xb5   :  { %s1166_s23 = sshll.u32 %s2087_s4, 4  ;;  %s1167_s23 = int_to_ptr.vmem [resolvable:$true] %s1166_s23 }
  0xb6   :  { %1737 = vmatpush3.bf16.msra.mxu1 %v1736_v57  ;;  %v100_v57 = vld [vmem:[#allocation7 + $0xb0] sm:$0xff]  ;;  %s2045_s24 = scalar_lea.vmem %s1167_s23, 32  ;;  %p2050_p5 = scmp.lt.s32.totalorder %s1167_s23, %s1167_s23 }
  0xb7   :  { %1739 = vmatprep.subr.bf16.mxu1 %v1738_v58  ;;  %v1780_v58 = vpack.c.bf16 %v100_v57, %v98_v56  ;;  %v727_v56 = vld [vmem:[#allocation8 + $0x8] sm:$0xff]  ;;  %p2046_p4 = scmp.ne.s32.totalorder %s1167_s23, %s2045_s24  ;;  %p2051_p6 = scmp.lt.s32.totalorder %s2045_s24, %s2045_s24 }
  0xb9   :  { %p2052_p7 = por %p2051_p6, %p2050_p5 }
  0xba   :  { %1741 = vmatpush3.bf16.msra.mxu1 %v1740_v0  ;;  %v104_v0 = vld [vmem:[#allocation7 + $0xd0] sm:$0xff] }
  0xbb   :  { %1743 = vmatprep.subr.bf16.mxu1 %v1742_v49  ;;  %v1784_v49 = vpack.c.bf16 %v104_v0, %v102_v63  ;;  %v728_v63 = vld [vmem:[#allocation8 + $0x10] sm:$0xff]  ;;  %v729_v0 = vld [vmem:[#allocation8 + $0x18] sm:$0xff]  ;;  %p2053_p8 = pnand %p2052_p7, %p2046_p4 }
  0xbe   :  { %1745 = vmatpush3.bf16.msra.mxu1 %v1744_v5  ;;  %v108_v5 = vld [vmem:[#allocation7 + $0xf0] sm:$0xff] }
  0xbf   :  { %1747 = vmatprep.subr.bf16.mxu1 %v1746_v6  ;;  %v1788_v6 = vpack.c.bf16 %v108_v5, %v106_v4  ;;  %v732_v4 = vld [vmem:[#allocation8 + $0x30] sm:$0xff]  ;;  %v733_v5 = vld [vmem:[#allocation8 + $0x38] sm:$0xff] }
  0xc2   :  { %1749 = vmatpush3.bf16.msra.mxu1 %v1748_v11 }
  0xc3   :  { %1751 = vmatprep.subr.bf16.mxu1 %v1750_v60  ;;  %v1177_v60 = vld [vmem:[%s2310_s2] ss:$0 sm:$0xff] }
  0xc6   :  { %1753 = vmatpush3.bf16.msra.mxu1 %v1752_v16 }
  0xc7   :  { %1755 = vmatprep.subr.bf16.mxu1 %v1754_v18 }
  0xca   :  { %1757 = vmatpush3.bf16.msra.mxu1 %v1756_v21 }
  0xcb   :  { %1790 = vmatprep.subr.bf16.mxu1 %v2085_v8 }
  0xcd   :  { %566 = vmatmul.mubr.f32.vlgmr.msra.gmra.mrb[6].mxu1 %v2200_v38  ;;  %v86_v38 = vld [vmem:[#allocation7 + $0x40] sm:$0xff] }
  0xce   :  { %v1768_v42 = vpack.c.bf16 %v88_v39, %v86_v38  ;;  %1792 = vmatpush3.bf16.msra.mxu1 %v2206_v26  ;;  %v742_v26 = vld [vmem:[#allocation8 + $0x80] sm:$0xff]  ;;  %v749_v38 = vld [vmem:[#allocation8 + $0xb8] sm:$0xff]  ;;  %1452 = vmatprep.mubr.msk.f32.mxu1 %vm2086_vm0, %v2084_v7 }
  0xcf   :  { %1793 = vmatprep.subr.bf16.mxu1 %v2085_v8  ;;  %v1815_v29 = vpack.c.bf16 %v743_v27, %v742_v26  ;;  %v761_v26 = vld [vmem:[#allocation8 + $0x118] sm:$0xff] }
  0xd0   :  { %1769 = vmatpush1.bf16.msra.mxu0 %v1768_v42  ;;  %v1827_v42 = vpack.c.bf16 %v751_v41, %v750_v40  ;;  %v770_v40 = vld [vmem:[#allocation8 + $0x160] sm:$0xff]  ;;  %v771_v41 = vld [vmem:[#allocation8 + $0x168] sm:$0xff] }
  0xd1   :  { %1771 = vmatprep.subr.bf16.mxu0 %v1770_v43 }
  0xd2   :  { %1795 = vmatpush3.bf16.msra.mxu1 %v1762_v31  ;;  %v744_v31 = vld [vmem:[#allocation8 + $0x90] sm:$0xff] }
  0xd3   :  { %1796 = vmatprep.subr.bf16.mxu1 %v2085_v8  ;;  %v1818_v33 = vpack.c.bf16 %v745_v32, %v744_v31  ;;  %v764_v32 = vld [vmem:[#allocation8 + $0x130] sm:$0xff] }
  0xd4   :  { %1773 = vmatpush1.bf16.msra.mxu0 %v1772_v48  ;;  %v1833_v48 = vpack.c.bf16 %v755_v47, %v754_v46  ;;  %v774_v46 = vld [vmem:[#allocation8 + $0x180] sm:$0xff]  ;;  %v775_v47 = vld [vmem:[#allocation8 + $0x188] sm:$0xff] }
  0xd5   :  { %1775 = vmatprep.subr.bf16.mxu0 %v1774_v50 }
  0xd6   :  { %1798 = vmatpush3.bf16.msra.mxu1 %v1766_v37  ;;  %v748_v37 = vld [vmem:[#allocation8 + $0xb0] sm:$0xff] }
  0xd7   :  { %1799 = vmatprep.subr.bf16.mxu1 %v2085_v8  ;;  %v1824_v39 = vpack.c.bf16 %v749_v38, %v748_v37  ;;  %v768_v37 = vld [vmem:[#allocation8 + $0x150] sm:$0xff]  ;;  %v769_v38 = vld [vmem:[#allocation8 + $0x158] sm:$0xff] }
  0xd8   :  { %1777 = vmatpush1.bf16.msra.mxu0 %v1776_v54  ;;  %v576_v54 = vrot.slane %v2242_v53, %v575_v52  ;;  %v778_v52 = vld [vmem:[#allocation8 + $0x1a0] sm:$0xff] }
  0xd9   :  { %1779 = vmatprep.subr.bf16.mxu0 %v1778_v55 }
  0xda   :  { %1801 = vmatpush3.bf16.msra.mxu1 %v1770_v43  ;;  %v752_v43 = vld [vmem:[#allocation8 + $0xd0] sm:$0xff] }
  0xdb   :  { %1802 = vmatprep.subr.bf16.mxu1 %v2085_v8  ;;  %v1830_v45 = vpack.c.bf16 %v753_v44, %v752_v43  ;;  %v772_v43 = vld [vmem:[#allocation8 + $0x170] sm:$0xff]  ;;  %v773_v44 = vld [vmem:[#allocation8 + $0x178] sm:$0xff] }
  0xdc   :  { %1781 = vmatpush1.bf16.msra.mxu0 %v1780_v58 }
  0xdd   :  { %1783 = vmatprep.subr.bf16.mxu0 %v1782_v62 }
  0xde   :  { %1804 = vmatpush3.bf16.msra.mxu1 %v1774_v50  ;;  %v756_v50 = vld [vmem:[#allocation8 + $0xf0] sm:$0xff] }
  0xdf   :  { %1805 = vmatprep.subr.bf16.mxu1 %v2085_v8  ;;  %v1836_v24 = vpack.c.bf16 %v757_v51, %v756_v50  ;;  %v776_v50 = vld [vmem:[#allocation8 + $0x190] sm:$0xff]  ;;  %v777_v51 = vld [vmem:[#allocation8 + $0x198] sm:$0xff] }
  0xe0   :  { %1785 = vmatpush1.bf16.msra.mxu0 %v1784_v49  ;;  %v1842_v49 = vpack.c.bf16 %v729_v0, %v728_v63  ;;  %v784_v0 = vld [vmem:[#allocation8 + $0x1d0] sm:$0xff] }
  0xe1   :  { %1787 = vmatprep.subr.bf16.mxu0 %v1786_v3 }
  0xe2   :  { %1807 = vmatpush3.bf16.msra.mxu1 %v1778_v55  ;;  %v726_v55 = vld [vmem:[#allocation8] sm:$0xff] }
  0xe3   :  { %1808 = vmatprep.subr.bf16.mxu1 %v2085_v8  ;;  %v1839_v61 = vpack.c.bf16 %v727_v56, %v726_v55  ;;  %v780_v56 = vld [vmem:[#allocation8 + $0x1b0] sm:$0xff] }
  0xe4   :  { %1789 = vmatpush1.bf16.msra.mxu0 %v1788_v6  ;;  %v1848_v6 = vpack.c.bf16 %v733_v5, %v732_v4  ;;  %v579_v5 = vsub.s32 1, %v2177_v17  ;;  %v793_v17 = vld [vmem:[#allocation8 + $0x218] sm:$0xff] }
  0xe5   :  { %1814 = vmatprep.subr.bf16.mxu0 %v2085_v8 }
  0xe6   :  { %1810 = vmatpush3.bf16.msra.mxu1 %v1782_v62 }
  0xe7   :  { %1811 = vmatprep.subr.bf16.mxu1 %v2085_v8 }
  0xea   :  { %1813 = vmatpush3.bf16.msra.mxu1 %v1786_v3  ;;  %v1845_v3 = vpack.c.bf16 %v731_v2, %v730_v1  ;;  %v786_v2 = vld [vmem:[#allocation8 + $0x1e0] sm:$0xff] }
 0x140   :  { %v1210_v9 = vpop.f32.mrb[0].mxu1 }
 0x141   :  { %v1211_v10 = vpop.f32.mrb[1].mxu1 }
 0x142   :  { %v1212_v11 = vadd.f32 %v1211_v10, %v1210_v9  ;;  %v734_v9 = vld [vmem:[#allocation8 + $0x40] sm:$0xff]  ;;  %v735_v10 = vld [vmem:[#allocation8 + $0x48] sm:$0xff] }
 0x144   :  { %v358_v14 = vadd.f32 %v1212_v11, %v1177_v60  ;;  %v1851_v11 = vpack.c.bf16 %v735_v10, %v734_v9  ;;  %v736_v60 = vld [vmem:[#allocation8 + $0x50] sm:$0xff]  ;;  %v789_v9 = vld [vmem:[#allocation8 + $0x1f8] sm:$0xff] }
 0x160   :  { %v1245_v12 = vpop.f32.mrb[2].mxu1 }
 0x161   :  { %v1246_v13 = vpop.f32.mrb[3].mxu1 }
 0x162   :  { %v1247_v15 = vadd.f32 %v1246_v13, %v1245_v12  ;;  %v737_v12 = vld [vmem:[#allocation8 + $0x58] sm:$0xff] }
 0x163   :  { %v1854_v13 = vpack.c.bf16 %v737_v12, %v736_v60  ;;  %v790_v60 = vld [vmem:[#allocation8 + $0x200] sm:$0xff]  ;;  %v791_v12 = vld [vmem:[#allocation8 + $0x208] sm:$0xff] }
 0x164   :  { %v428_v16 = vadd.f32 %v1247_v15, %v358_v14  ;;  %v738_v14 = vld [vmem:[#allocation8 + $0x60] sm:$0xff]  ;;  %v739_v15 = vld [vmem:[#allocation8 + $0x68] sm:$0xff] }
 0x180   :  { %v1280_v18 = vpop.f32.mrb[4].mxu1 }
 0x181   :  { %v1281_v19 = vpop.f32.mrb[5].mxu1 }
 0x182   :  { %v1282_v20 = vadd.f32 %v1281_v19, %v1280_v18  ;;  %v740_v18 = vld [vmem:[#allocation8 + $0x70] sm:$0xff]  ;;  %v741_v19 = vld [vmem:[#allocation8 + $0x78] sm:$0xff] }
 0x184   :  { %v498_v21 = vadd.f32 %v1282_v20, %v428_v16  ;;  %v1857_v16 = vpack.c.bf16 %v739_v15, %v738_v14  ;;  %v1860_v20 = vpack.c.bf16 %v741_v19, %v740_v18  ;;  %v792_v15 = vld [vmem:[#allocation8 + $0x210] sm:$0xff]  ;;  %v795_v18 = vld [vmem:[#allocation8 + $0x228] sm:$0xff] }
 0x1a0   :  { %v1315_v22 = vpop.f32.mrb[6].mxu1 }
 0x1a1   :  { %v1316_v23 = vpop.f32.mrb[7].mxu1 }
 0x1a2   :  { %v1317_v25 = vadd.f32 %v1316_v23, %v1315_v22  ;;  %v759_v22 = vld [vmem:[#allocation8 + $0x108] sm:$0xff] }
 0x1a4   :  { %v568_v28 = vadd.f32 %v1317_v25, %v498_v21  ;;  %v758_v21 = vld [vmem:[#allocation8 + $0x100] sm:$0xff]  ;;  %v760_v25 = vld [vmem:[#allocation8 + $0x110] sm:$0xff] }
 0x1a5   :  { %v1863_v23 = vpack.c.bf16 %v759_v22, %v758_v21  ;;  %v1866_v27 = vpack.c.bf16 %v761_v26, %v760_v25  ;;  %v798_v22 = vld [vmem:[#allocation8 + $0x240] sm:$0xff]  ;;  %v801_v26 = vld [vmem:[#allocation8 + $0x258] sm:$0xff] }
 0x1a6   :  { %v2223_v30 = vmax.f32 %v568_v28, 0.0  ;;  %v762_v28 = vld [vmem:[#allocation8 + $0x120] sm:$0xff] }
 0x1a8   :  { %648 = vmatmul.mubr.f32.vlgmr.msra.gmra.mrb[0].mxu0 %v2223_v30 }
 0x1a9   :  { %1816 = vmatpush3.bf16.msra.mxu0 %v1815_v29  ;;  %1487 = vmatprep.mubr.msk.f32.mxu0 %vm2086_vm0, %v2084_v7  ;;  %v763_v29 = vld [vmem:[#allocation8 + $0x128] sm:$0xff] }
 0x1aa   :  { %1817 = vmatprep.subr.bf16.mxu0 %v2085_v8  ;;  %v1869_v31 = vpack.c.bf16 %v763_v29, %v762_v28  ;;  %v802_v28 = vld [vmem:[#allocation8 + $0x260] sm:$0xff]  ;;  %v803_v29 = vld [vmem:[#allocation8 + $0x268] sm:$0xff] }
 0x1ad   :  { %1819 = vmatpush3.bf16.msra.mxu0 %v1818_v33  ;;  %v765_v33 = vld [vmem:[#allocation8 + $0x138] sm:$0xff] }
 0x1ae   :  { %1820 = vmatprep.subr.bf16.mxu0 %v2085_v8  ;;  %v1872_v34 = vpack.c.bf16 %v765_v33, %v764_v32  ;;  %v804_v32 = vld [vmem:[#allocation8 + $0x270] sm:$0xff]  ;;  %v805_v33 = vld [vmem:[#allocation8 + $0x278] sm:$0xff] }
 0x1b1   :  { %1822 = vmatpush3.bf16.msra.mxu0 %v1821_v36 }
 0x1b2   :  { %1823 = vmatprep.subr.bf16.mxu0 %v2085_v8 }
 0x1b5   :  { %1825 = vmatpush3.bf16.msra.mxu0 %v1824_v39  ;;  %v1878_v39 = vpack.c.bf16 %v769_v38, %v768_v37 }
 0x1b6   :  { %1826 = vmatprep.subr.bf16.mxu0 %v2085_v8 }
 0x1b9   :  { %1828 = vmatpush3.bf16.msra.mxu0 %v1827_v42  ;;  %v1881_v42 = vpack.c.bf16 %v771_v41, %v770_v40 }
 0x1ba   :  { %1829 = vmatprep.subr.bf16.mxu0 %v2085_v8 }
 0x1bd   :  { %1831 = vmatpush3.bf16.msra.mxu0 %v1830_v45  ;;  %v1884_v45 = vpack.c.bf16 %v773_v44, %v772_v43 }
 0x1be   :  { %1832 = vmatprep.subr.bf16.mxu0 %v2085_v8 }
 0x1c1   :  { %1834 = vmatpush3.bf16.msra.mxu0 %v1833_v48  ;;  %v1887_v48 = vpack.c.bf16 %v775_v47, %v774_v46 }
 0x1c2   :  { %1835 = vmatprep.subr.bf16.mxu0 %v2085_v8 }
 0x1c5   :  { %1837 = vmatpush3.bf16.msra.mxu0 %v1836_v24  ;;  %v1890_v24 = vpack.c.bf16 %v777_v51, %v776_v50 }
 0x1c6   :  { %1838 = vmatprep.subr.bf16.mxu0 %v2085_v8 }
 0x27b   :  { %v649_v57 = vpop.f32.mrb[0].mxu0 }
 0x27c   :  { %v2245_v58 = vadd.f32 %v649_v57, %v576_v54  ;;  %v2247_v59 = vpop.f32.mrb[1].mxu0  ;;  %v779_v54 = vld [vmem:[#allocation8 + $0x1a8] sm:$0xff]  ;;  %v781_v57 = vld [vmem:[#allocation8 + $0x1b8] sm:$0xff] }
 0x27d   :  { %v1893_v55 = vpack.c.bf16 %v779_v54, %v778_v52 }
 0x27e   :  { %v654_v62 = vadd.f32 %v2245_v58, %v2223_v30  ;;  %1453 = vmatmul.mubr.f32.vlgmr.msra.gmra.mrb[8].mxu1 %v2245_v58 }
 0x280   :  { %1488 = vmatmul.mubr.f32.vlgmr.msra.gmra.mrb[2].mxu0 %v654_v62  ;;  %v783_v62 = vld [vmem:[#allocation8 + $0x1c8] sm:$0xff] }
 0x281   :  { %1840 = vmatpush3.bf16.msra.mxu0 %v1839_v61  ;;  %1522 = vmatprep.mubr.msk.f32.mxu0 %vm2086_vm0, %v2084_v7  ;;  %v1896_v61 = vpack.c.bf16 %v781_v57, %v780_v56 }
 0x282   :  { %1841 = vmatprep.subr.bf16.mxu0 %v2085_v8 }
 0x285   :  { %1843 = vmatpush3.bf16.msra.mxu0 %v1842_v49  ;;  %v785_v49 = vld [vmem:[#allocation8 + $0x1d8] sm:$0xff] }
 0x286   :  { %1844 = vmatprep.subr.bf16.mxu0 %v2085_v8  ;;  %v1902_v1 = vpack.c.bf16 %v785_v49, %v784_v0 }
 0x289   :  { %1846 = vmatpush3.bf16.msra.mxu0 %v1845_v3  ;;  %v787_v3 = vld [vmem:[#allocation8 + $0x1e8] sm:$0xff] }
 0x28a   :  { %1847 = vmatprep.subr.bf16.mxu0 %v2085_v8  ;;  %v1905_v4 = vpack.c.bf16 %v787_v3, %v786_v2 }
 0x28d   :  { %1849 = vmatpush3.bf16.msra.mxu0 %v1848_v6  ;;  %v788_v6 = vld [vmem:[#allocation8 + $0x1f0] sm:$0xff] }
 0x28e   :  { %1850 = vmatprep.subr.bf16.mxu0 %v2085_v8  ;;  %v1908_v10 = vpack.c.bf16 %v789_v9, %v788_v6 }
 0x291   :  { %1852 = vmatpush3.bf16.msra.mxu0 %v1851_v11  ;;  %v580_v11 = vrot.slane %v2242_v53, %v579_v5  ;;  %v794_v53 = vld [vmem:[#allocation8 + $0x220] sm:$0xff] }
 0x292   :  { %1853 = vmatprep.subr.bf16.mxu0 %v2085_v8  ;;  %v1917_v19 = vpack.c.bf16 %v795_v18, %v794_v53 }
 0x293   :  { %v652_v14 = vadd.f32 %v2247_v59, %v580_v11  ;;  %v797_v59 = vld [vmem:[#allocation8 + $0x238] sm:$0xff] }
 0x295   :  { %1855 = vmatpush3.bf16.msra.mxu0 %v1854_v13  ;;  %v1911_v13 = vpack.c.bf16 %v791_v12, %v790_v60 }
 0x296   :  { %1856 = vmatprep.subr.bf16.mxu0 %v2085_v8 }
 0x299   :  { %1858 = vmatpush3.bf16.msra.mxu0 %v1857_v16  ;;  %v1914_v16 = vpack.c.bf16 %v793_v17, %v792_v15 }
 0x29a   :  { %1859 = vmatprep.subr.bf16.mxu0 %v2085_v8 }
 0x29d   :  { %1861 = vmatpush3.bf16.msra.mxu0 %v1860_v20  ;;  %v796_v20 = vld [vmem:[#allocation8 + $0x230] sm:$0xff] }
 0x29e   :  { %1862 = vmatprep.subr.bf16.mxu0 %v2085_v8  ;;  %v1920_v21 = vpack.c.bf16 %v797_v59, %v796_v20 }
 0x2a0   :  { %1523 = vmatmul.mubr.f32.vlgmr.msra.gmra.mrb[2].mxu0 %v2223_v30  ;;  %v766_v30 = vld [vmem:[#allocation8 + $0x140] sm:$0xff] }
 0x2a1   :  { %1864 = vmatpush3.bf16.msra.mxu0 %v1863_v23  ;;  %1557 = vmatprep.mubr.msk.f32.mxu0 %vm2086_vm0, %v2084_v7  ;;  %v1875_v36 = vpack.c.bf16 %v767_v35, %v766_v30  ;;  %v799_v23 = vld [vmem:[#allocation8 + $0x248] sm:$0xff] }
 0x2a2   :  { %1865 = vmatprep.subr.bf16.mxu0 %v2085_v8  ;;  %v1923_v25 = vpack.c.bf16 %v799_v23, %v798_v22 }
 0x2a5   :  { %1867 = vmatpush3.bf16.msra.mxu0 %v1866_v27 }
 0x2a6   :  { %1868 = vmatprep.subr.bf16.mxu0 %v2085_v8 }
 0x2a9   :  { %1870 = vmatpush3.bf16.msra.mxu0 %v1869_v31  ;;  %v1929_v31 = vpack.c.bf16 %v803_v29, %v802_v28 }
 0x2aa   :  { %1871 = vmatprep.subr.bf16.mxu0 %v2085_v8 }
 0x2ad   :  { %1873 = vmatpush3.bf16.msra.mxu0 %v1872_v34  ;;  %v1932_v34 = vpack.c.bf16 %v805_v33, %v804_v32 }
 0x2ae   :  { %1874 = vmatprep.subr.bf16.mxu0 %v2085_v8 }
 0x2b1   :  { %1876 = vmatpush3.bf16.msra.mxu0 %v1875_v36 }
 0x2b2   :  { %1877 = vmatprep.subr.bf16.mxu0 %v2085_v8 }
 0x2b5   :  { %1879 = vmatpush3.bf16.msra.mxu0 %v1878_v39 }
 0x2b6   :  { %1880 = vmatprep.subr.bf16.mxu0 %v2085_v8 }
 0x2b9   :  { %1882 = vmatpush3.bf16.msra.mxu0 %v1881_v42 }
 0x2ba   :  { %1883 = vmatprep.subr.bf16.mxu0 %v2085_v8 }
 0x2bd   :  { %1885 = vmatpush3.bf16.msra.mxu0 %v1884_v45 }
 0x2be   :  { %1886 = vmatprep.subr.bf16.mxu0 %v2085_v8 }
 0x2c0   :  { %1558 = vmatmul.mubr.f32.vlgmr.msra.gmra.mrb[2].mxu0 %v2245_v58  ;;  %v782_v58 = vld [vmem:[#allocation8 + $0x1c0] sm:$0xff] }
 0x2c1   :  { %1888 = vmatpush3.bf16.msra.mxu0 %v1887_v48  ;;  %1592 = vmatprep.mubr.msk.f32.mxu0 %vm2086_vm0, %v2084_v7  ;;  %v1899_v63 = vpack.c.bf16 %v783_v62, %v782_v58 }
 0x2c2   :  { %1889 = vmatprep.subr.bf16.mxu0 %v2085_v8 }
 0x2c5   :  { %1891 = vmatpush3.bf16.msra.mxu0 %v1890_v24 }
 0x2c6   :  { %1892 = vmatprep.subr.bf16.mxu0 %v2085_v8 }
 0x2c9   :  { %1894 = vmatpush3.bf16.msra.mxu0 %v1893_v55 }
 0x2ca   :  { %1895 = vmatprep.subr.bf16.mxu0 %v2085_v8 }
 0x2cd   :  { %1897 = vmatpush3.bf16.msra.mxu0 %v1896_v61 }
 0x2ce   :  { %1898 = vmatprep.subr.bf16.mxu0 %v2085_v8 }
 0x2d1   :  { %1900 = vmatpush3.bf16.msra.mxu0 %v1899_v63 }
 0x2d2   :  { %1901 = vmatprep.subr.bf16.mxu0 %v2085_v8 }
 0x2d5   :  { %1903 = vmatpush3.bf16.msra.mxu0 %v1902_v1 }
 0x2d6   :  { %1904 = vmatprep.subr.bf16.mxu0 %v2085_v8 }
 0x2d9   :  { %1906 = vmatpush3.bf16.msra.mxu0 %v1905_v4 }
 0x2da   :  { %1907 = vmatprep.subr.bf16.mxu0 %v2085_v8 }
 0x2dd   :  { %1909 = vmatpush3.bf16.msra.mxu0 %v1908_v10 }
 0x2de   :  { %1910 = vmatprep.subr.bf16.mxu0 %v2085_v8 }
 0x2e0   :  { %1593 = vmatmul.mubr.f32.vlgmr.msra.gmra.mrb[2].mxu0 %v652_v14 }
 0x2e1   :  { %1912 = vmatpush3.bf16.msra.mxu0 %v1911_v13  ;;  %1627 = vmatprep.mubr.msk.f32.mxu0 %vm2086_vm0, %v2084_v7  ;;  %v800_v7 = vld [vmem:[#allocation8 + $0x250] sm:$0xff] }
 0x2e2   :  { %1913 = vmatprep.subr.bf16.mxu0 %v2085_v8  ;;  %v1926_v27 = vpack.c.bf16 %v801_v26, %v800_v7 }
 0x2e5   :  { %1915 = vmatpush3.bf16.msra.mxu0 %v1914_v16 }
 0x2e6   :  { %1916 = vmatprep.subr.bf16.mxu0 %v2085_v8 }
 0x2e9   :  { %1918 = vmatpush3.bf16.msra.mxu0 %v1917_v19 }
 0x2ea   :  { %1919 = vmatprep.subr.bf16.mxu0 %v2085_v8 }
 0x2ed   :  { %1921 = vmatpush3.bf16.msra.mxu0 %v1920_v21 }
 0x2ee   :  { %1922 = vmatprep.subr.bf16.mxu0 %v2085_v8 }
 0x2f1   :  { %1924 = vmatpush3.bf16.msra.mxu0 %v1923_v25 }
 0x2f2   :  { %1925 = vmatprep.subr.bf16.mxu0 %v2085_v8 }
 0x2f5   :  { %1927 = vmatpush3.bf16.msra.mxu0 %v1926_v27 }
 0x2f6   :  { %1928 = vmatprep.subr.bf16.mxu0 %v2085_v8 }
 0x2f9   :  { %1930 = vmatpush3.bf16.msra.mxu0 %v1929_v31 }
 0x2fa   :  { %1931 = vmatprep.subr.bf16.mxu0 %v2085_v8 }
 0x2fd   :  { %1933 = vmatpush3.bf16.msra.mxu0 %v1932_v34 }
 0x351   :  { %v721_v30 = vpop.f32.mrb[8].mxu1 }
 0x352   :  { %v725_v35 = vadd.f32 %v721_v30, %v652_v14  ;;  %v1454_v36 = vpop.f32.mrb[9].mxu1 }
 0x354   :  { %1628 = vmatmul.mubr.f32.vlgmr.msra.gmra.mrb[2].mxu0 %v725_v35 }
 0x427   :  { %v1154_v37 = vpop.f32.mrb[2].mxu0 }
 0x428   :  { %1159 = vst [vmem:[#allocation10] sm:$0x3] %v1154_v37  ;;  %v1629_v38 = vpop.f32.mrb[3].mxu0 }
 0x429   :  { %2056 = shalt.err (!%p2053_p8)
}
 0x42a   :  { %s2057_s27 = scalar_lea.hbm %s2314_s6, 32 }
 0x42b   :  { %p2058_p9 = scmp.ne.s32.totalorder %s2314_s6, %s2057_s27  ;;  %p2061_p10 = scmp.lt.u32.totalorder %s2057_s27, %s2314_s6 }
 0x42d   :  { %p2063_p11 = pnand %p2061_p10, %p2058_p9 }
 0x42f   :  { %2066 = shalt.err (!%p2063_p11)
}
 0x430   :  { %1169 = dma.vmem_to_hbm [thread:$0]  %s1167_s23, 32, %s2314_s6, [#allocation4]  }
 0x431   :  { %2073 = dma.done.wait [#allocation4], 32  }
 0x432   :  { %2074 = vsyncadd [#allocation4], 4294967264 }
 0x433   :  { %1173 = vsyncpa [#allocation3], 1 }
 0x434   :  { %1174 = vsyncpa [#allocation6], 1 }
 0x435   :  { %1175 = vsyncpa [#allocation9], 1 }
 0x436   :  { %1176 = vsyncpa [#allocation4], 1 }

</bundles_post_ra>
